<compile_context>
chip_gen: v6e
topology: v6e:2x2x1
jax: 0.10.0
libtpu: 0.0.40
codegen_flags: <defaults>
</compile_context>

<pallas_src>
import functools

import jax
import jax.numpy as jnp
from jax.experimental import pallas as pl
from jax.experimental.pallas import tpu as pltpu


# ----------------------------------------------------------------------------
# Sizing helpers
# ----------------------------------------------------------------------------
def _vmem_limit_bytes():
    """Per-generation scoped-VMEM limit (v7x has 64 MiB physical, others 128)."""
    kind = ""
    try:
        kind = jax.devices()[0].device_kind.lower()
    except Exception:
        pass
    if "v7" in kind or "tpu7" in kind:
        return 48 * 1024 * 1024
    return 96 * 1024 * 1024


def _pick_seq_tile(seq_len, cap):
    """Largest multiple of 8 <= cap that divides seq_len; else the full seq."""
    best = 0
    t = 8
    while t <= min(seq_len, cap):
        if seq_len % t == 0:
            best = t
        t += 8
    return best if best > 0 else seq_len


# ----------------------------------------------------------------------------
# Path 1: VMEM-resident embedding table (small V*d) — one-hot matmul gather
# ----------------------------------------------------------------------------
def _embed_resident_kernel(tok_ref,   # (1, ts, 1) int32
                           e_ref,     # (V, d)  resident in VMEM
                           p_ref,     # (ts, d) resident across the batch axis
                           x_ref,     # (1, ts, d) output block
                           *, vocab):
    ts = tok_ref.shape[1]
    tok = tok_ref[0]                                               # (ts, 1)
    lane_ids = jax.lax.broadcasted_iota(jnp.int32, (ts, vocab), 1)
    onehot = (tok == lane_ids).astype(e_ref.dtype)                 # exact 0/1
    # Exact row gather: one nonzero term per output row, f32 accumulation.
    rows = jnp.dot(onehot, e_ref[...], preferred_element_type=jnp.float32)
    x_ref[0] = (rows + p_ref[...].astype(jnp.float32)).astype(x_ref.dtype)


def _forward_resident(tok_i32, e_table, p_rows, vmem_limit):
    B, S = tok_i32.shape
    V, d = e_table.shape
    itemsize = jnp.dtype(e_table.dtype).itemsize

    # Tile budget after reserving the (auto double-buffered) resident table.
    tile_budget = max(vmem_limit // 2 - 2 * V * d * itemsize, 512 * 1024)
    per_row = 4 * d * itemsize + 4 * V + 8 * d   # P/X (x2 bufs) + one-hot + temps
    ts = _pick_seq_tile(S, min(512, max(8, tile_budget // per_row)))
    num_st = S // ts

    tok_col = tok_i32.reshape(B, S, 1)
    kernel = functools.partial(_embed_resident_kernel, vocab=V)

    return pl.pallas_call(
        kernel,
        out_shape=jax.ShapeDtypeStruct((B, S, d), e_table.dtype),
        grid_spec=pltpu.PrefetchScalarGridSpec(
            num_scalar_prefetch=0,
            grid=(num_st, B),
            in_specs=[
                pl.BlockSpec((1, ts, 1), lambda st, b: (b, st, 0)),  # token ids
                pl.BlockSpec((V, d), lambda st, b: (0, 0)),          # E resident
                pl.BlockSpec((ts, d), lambda st, b: (st, 0)),        # P resident over b
            ],
            out_specs=pl.BlockSpec((1, ts, d), lambda st, b: (b, st, 0)),
        ),
        compiler_params=pltpu.CompilerParams(
            dimension_semantics=("parallel", "parallel"),
            vmem_limit_bytes=vmem_limit,
        ),
        cost_estimate=pl.CostEstimate(
            flops=2 * B * S * V * d + B * S * d,
            transcendentals=0,
            bytes_accessed=int(V * d * itemsize + S * d * itemsize
                               + B * S * d * itemsize + B * S * 4),
        ),
    )(tok_col, e_table, p_rows)


# ----------------------------------------------------------------------------
# Path 2: E stays in HBM — per-row DMA gather, double-buffered across grid steps
# ----------------------------------------------------------------------------
def _embed_gather_kernel(tok_smem,    # (B*S,) int32 in SMEM (scalar prefetch)
                         e_hbm,       # (V, d) embedding table, raw HBM ref
                         p_ref,       # (ts, d) positional rows, VMEM
                         x_ref,       # (1, ts, d) output block
                         gather_buf,  # (2, ts, d) VMEM scratch (double buffer)
                         sems,        # (2, ts) DMA semaphores
                         *, seq_len, ts):
    st = pl.program_id(0)
    b = pl.program_id(1)
    nb = pl.num_programs(1)
    step = st * nb + b
    total = pl.num_programs(0) * nb
    slot = step % 2
    nslot = 1 - slot

    def issue(tile_st, tile_b, dst_slot):
        base = tile_b * seq_len + tile_st * ts
        for s in range(ts):                      # unrolled: ts is static
            tok = tok_smem[base + s]
            pltpu.make_async_copy(
                e_hbm.at[pl.ds(tok, 1), :],
                gather_buf.at[dst_slot, pl.ds(s, 1), :],
                sems.at[dst_slot, s],
            ).start()

    # Prime the pipeline on the very first grid step.
    @pl.when(step == 0)
    def _():
        issue(st, b, slot)

    # Prefetch the NEXT grid step's rows into the other slot before waiting on
    # the current slot: the gather overlaps this step's add + output writeback.
    @pl.when(step + 1 < total)
    def _():
        nxt = step + 1
        issue(nxt // nb, nxt % nb, nslot)

    # Current-tile token ids are read from SMEM before any .wait() (keeps
    # sst->sld forwarding alive) and let us rebuild the exact start descriptors.
    cur_base = b * seq_len + st * ts
    cur_toks = [tok_smem[cur_base + s] for s in range(ts)]
    for s in range(ts):                          # unrolled waits
        pltpu.make_async_copy(
            e_hbm.at[pl.ds(cur_toks[s], 1), :],
            gather_buf.at[slot, pl.ds(s, 1), :],
            sems.at[slot, s],
        ).wait()

    # X = E[tokens] + P(positions): single (ts, d) VPU add + store.
    x_ref[0] = (gather_buf[slot] + p_ref[...]).astype(x_ref.dtype)


def _forward_hbm_gather(tok_i32, e_table, p_rows, vmem_limit):
    B, S = tok_i32.shape
    V, d = e_table.shape
    itemsize = jnp.dtype(e_table.dtype).itemsize

    # ts capped at 128: bounds the (2, ts) semaphore array and unroll size.
    ts = _pick_seq_tile(S, 128)
    num_st = S // ts

    tok_flat = tok_i32.reshape(B * S)
    kernel = functools.partial(_embed_gather_kernel, seq_len=S, ts=ts)

    return pl.pallas_call(
        kernel,
        out_shape=jax.ShapeDtypeStruct((B, S, d), e_table.dtype),
        grid_spec=pltpu.PrefetchScalarGridSpec(
            num_scalar_prefetch=1,
            grid=(num_st, B),
            in_specs=[
                pl.BlockSpec(memory_space=pl.ANY),                  # E stays in HBM
                pl.BlockSpec((ts, d), lambda st, b, tok: (st, 0)),  # P resident over b
            ],
            out_specs=pl.BlockSpec((1, ts, d), lambda st, b, tok: (b, st, 0)),
            scratch_shapes=[
                pltpu.VMEM((2, ts, d), e_table.dtype),
                pltpu.SemaphoreType.DMA((2, ts)),
            ],
        ),
        compiler_params=pltpu.CompilerParams(
            # The prefetch into the other slot carries state across grid steps,
            # so the grid must run as a single sequential loop; "arbitrary"
            # guarantees that even on multi-TensorCore parts (v7x).
            dimension_semantics=("arbitrary", "arbitrary"),
            vmem_limit_bytes=vmem_limit,
        ),
        cost_estimate=pl.CostEstimate(
            flops=B * S * d,
            transcendentals=0,
            bytes_accessed=int(2 * B * S * d * itemsize + S * d * itemsize
                               + B * S * 4),
        ),
    )(tok_flat, e_table, p_rows)


# ----------------------------------------------------------------------------
# Public wrapper (forward of the PyTorch EmbeddingLayer)
# ----------------------------------------------------------------------------
def embedding_forward(token_batch, e_table, p_table, padding_token_index,
                      *, force_hbm_gather=False):
    """token_batch: (B, S) int; e_table: (V, d); p_table: (context_len, d)."""
    B, S = token_batch.shape
    V, d = e_table.shape
    assert S <= p_table.shape[0], "seq_len exceeds positional context length"
    itemsize = jnp.dtype(e_table.dtype).itemsize

    # padding_mask = tokens != padding_token_index  (plain XLA, fuses for free).
    padding_mask = token_batch != padding_token_index

    # Defensive clamp so a bad token id can never drive an out-of-bounds gather.
    tok_i32 = jnp.clip(token_batch.astype(jnp.int32), 0, V - 1)
    p_rows = p_table[:S]                 # positions = arange(S)

    vmem_limit = _vmem_limit_bytes()
    table_bytes = V * d * itemsize
    use_resident = (not force_hbm_gather
                    and table_bytes <= vmem_limit // 4
                    and V <= 4096)       # keeps the (ts, V) one-hot tile modest

    if use_resident:
        x = _forward_resident(tok_i32, e_table, p_rows, vmem_limit)
    else:
        x = _forward_hbm_gather(tok_i32, e_table, p_rows, vmem_limit)
    return x, padding_mask


def embedding_reference(token_batch, e_table, p_table, padding_token_index):
    """Pure-JAX mirror of the PyTorch module, for verification."""
    _, S = token_batch.shape
    x = e_table[token_batch] + p_table[jnp.arange(S)][None, :, :]
    mask = token_batch != padding_token_index
    return x, mask


if __name__ == "__main__":
    B, S, d = 2, 8, 32
    vocab_size, context_len, pad_idx = 64, 16, 0

    key = jax.random.PRNGKey(0)
    k_tok, k_e, k_p = jax.random.split(key, 3)

    # Tokens in [1, vocab); second sequence padded after 5 positions.
    tokens = jax.random.randint(k_tok, (B, S), 1, vocab_size, dtype=jnp.int32)
    lengths = jnp.array([S, 5], dtype=jnp.int32)
    valid = jnp.arange(S)[None, :] < lengths[:, None]
    tokens = jnp.where(valid, tokens, pad_idx)

    e_table = jax.random.normal(k_e, (vocab_size, d), dtype=jnp.float32)
    p_table = jax.random.normal(k_p, (context_len, d), dtype=jnp.float32)

    x_ref, mask_ref = embedding_reference(tokens, e_table, p_table, pad_idx)

    # Path 1: VMEM-resident table (default dispatch for this small table).
    x1, m1 = embedding_forward(tokens, e_table, p_table, pad_idx)
    x1 = jax.block_until_ready(x1)
    m1 = jax.block_until_ready(m1)
    assert x1.shape == (B, S, d) and m1.shape == (B, S)
    assert bool(jnp.array_equal(m1, mask_ref)), "padding mask mismatch (resident)"
    assert bool(jnp.allclose(x1, x_ref, atol=1e-5, rtol=1e-5)), "embedding mismatch (resident)"

    # Path 2: HBM row-gather with cross-step double buffering (forced).
    x2, m2 = embedding_forward(tokens, e_table, p_table, pad_idx,
                               force_hbm_gather=True)
    x2 = jax.block_until_ready(x2)
    m2 = jax.block_until_ready(m2)
    assert bool(jnp.array_equal(m2, mask_ref)), "padding mask mismatch (gather)"
    assert bool(jnp.allclose(x2, x_ref, atol=1e-5, rtol=1e-5)), "embedding mismatch (gather)"

    print("KERNEL_OK")
</pallas_src>

<mosaic_0001>
module attributes {stable_mosaic.version = 11 : i64} {
  func.func @_embed_resident_kernel(%arg0: i32, %arg1: i32, %arg2: memref<1x8x1xi32, #tpu.memory_space<vmem>>, %arg3: memref<64x32xf32, #tpu.memory_space<vmem>>, %arg4: memref<8x32xf32, #tpu.memory_space<vmem>>, %arg5: memref<1x8x32xf32, #tpu.memory_space<vmem>>) attributes {dimension_semantics = [#tpu.dimension_semantics<parallel>, #tpu.dimension_semantics<parallel>], iteration_bounds = array<i64: 1, 2>, scalar_prefetch = 0 : i64, scratch_operands = 0 : i64, tpu.core_type = #tpu.core_type<tc>, window_params = [{transform_indices = @transform_0, window_bounds = array<i64: 1, 8, 1>}, {pipeline_mode = #tpu.pipeline_mode<synchronous>, transform_indices = @transform_1, window_bounds = array<i64: 64, 32>}, {transform_indices = @transform_2, window_bounds = array<i64: 8, 32>}, {transform_indices = @transform_3, window_bounds = array<i64: 1, 8, 32>}]} {
    %c0 = arith.constant 0 : index
    %c0_0 = arith.constant 0 : index
    %c0_1 = arith.constant 0 : index
    %0 = vector.load %arg2[%c0, %c0_0, %c0_1] : memref<1x8x1xi32, #tpu.memory_space<vmem>>, vector<1x8x1xi32>
    %1 = vector.shape_cast %0 : vector<1x8x1xi32> to vector<8x1xi32>
    %2 = tpu.iota {dimensions = array<i32: 1>} : vector<8x64xi32>
    %3 = vector.broadcast %1 : vector<8x1xi32> to vector<8x64xi32>
    %4 = arith.cmpi eq, %3, %2 : vector<8x64xi32>
    %5 = arith.extui %4 : vector<8x64xi1> to vector<8x64xi32>
    %6 = arith.sitofp %5 : vector<8x64xi32> to vector<8x64xf32>
    %c0_2 = arith.constant 0 : index
    %c0_3 = arith.constant 0 : index
    %7 = vector.load %arg3[%c0_2, %c0_3] : memref<64x32xf32, #tpu.memory_space<vmem>>, vector<64x32xf32>
    %cst = arith.constant dense<0.000000e+00> : vector<8x32xf32>
    %8 = tpu.matmul %6, %7, %cst {dimension_numbers = #tpu.dot_dimension_numbers<[1], [0], [0], [1], [0, 0, 1, 1], [], []>} : vector<8x64xf32>, vector<64x32xf32>, vector<8x32xf32> -> vector<8x32xf32>
    %c0_4 = arith.constant 0 : index
    %c0_5 = arith.constant 0 : index
    %9 = vector.load %arg4[%c0_4, %c0_5] : memref<8x32xf32, #tpu.memory_space<vmem>>, vector<8x32xf32>
    %10 = arith.addf %8, %9 : vector<8x32xf32>
    %c0_6 = arith.constant 0 : index
    %c0_7 = arith.constant 0 : index
    %c0_8 = arith.constant 0 : index
    %11 = vector.load %arg5[%c0_6, %c0_7, %c0_8] : memref<1x8x32xf32, #tpu.memory_space<vmem>>, vector<1x8x32xf32>
    %12 = vector.shape_cast %11 : vector<1x8x32xf32> to vector<8x32xf32>
    %13 = vector.shape_cast %10 : vector<8x32xf32> to vector<1x8x32xf32>
    tpu.vector_store %arg5[%c0_6, %c0_7, %c0_8], %13 {strides = array<i32>} : memref<1x8x32xf32, #tpu.memory_space<vmem>>, vector<1x8x32xf32>,
    return
  }
  func.func @transform_0(%arg0: i32, %arg1: i32) -> (i32, i32, i32) {
    %c0_i32 = arith.constant 0 : i32
    %c0_i32_0 = arith.constant 0 : i32
    return %arg1, %arg0, %c0_i32 : i32, i32, i32
  }
  func.func @transform_1(%arg0: i32, %arg1: i32) -> (i32, i32) {
    %c0_i32 = arith.constant 0 : i32
    %c0_i32_0 = arith.constant 0 : i32
    %c0_i32_1 = arith.constant 0 : i32
    return %c0_i32, %c0_i32_0 : i32, i32
  }
  func.func @transform_2(%arg0: i32, %arg1: i32) -> (i32, i32) {
    %c0_i32 = arith.constant 0 : i32
    %c0_i32_0 = arith.constant 0 : i32
    return %arg0, %c0_i32 : i32, i32
  }
  func.func @transform_3(%arg0: i32, %arg1: i32) -> (i32, i32, i32) {
    %c0_i32 = arith.constant 0 : i32
    %c0_i32_0 = arith.constant 0 : i32
    return %arg1, %arg0, %c0_i32 : i32, i32, i32
  }
}

</mosaic_0001>

<bundles_post_ra>
// kernel: tpu_custom_call.1
= control target key start
LH: loop header
LB: loop body
LE: loop exit
PB: predicated region body
PF: predicated region fallthrough
CT: control target
= control target key end

     0   :  { %8 = vsyncpa [#allocation3], 0  ;;  %s738_s0 = inlined_call_operand.vmem [shape: s32[2,8,1], index: 0, kind: input, shape index: {}]   ;;  %s739_s1 = inlined_call_operand.vmem [shape: f32[64,32], index: 1, kind: input, shape index: {}]   ;;  %s740_s2 = inlined_call_operand.vmem [shape: f32[8,32], index: 2, kind: input, shape index: {}]   ;;  %s741_s3 = inlined_call_operand.hbm [shape: f32[2,8,32], index: 3, kind: output, shape index: {}]  }
   0x1   :  { %10 = vsyncpa [#allocation3 + $0x1], 0  ;;  %s606_s12 = smov 0   ;;  %s608_s13 = smov 0  }
   0x2   :  { %s610_s14 = smov 0   ;;  %s612_s15 = smov 0  }
   0x3   :  { %s614_s16 = smov 0   ;;  %s616_s17 = smov 0  }
   0x4 LB: > { %s403_s18 = sadd.s32 4294967295, %s580_s17   ;;  %s404_s19 = sadd.s32 4294967294, %s580_s17   ;;  %s580_s17 = sphi %s616_s17, %s16_s17   ;;  %s576_s16 = sphi %s614_s16, %s748_s16   ;;  %s572_s15 = sphi %s612_s15, %s747_s15   ;;  %s568_s14 = sphi %s610_s14, %s746_s14   ;;  %s564_s13 = sphi %s608_s13, %s745_s13   ;;  %s560_s12 = sphi %s606_s12, %s744_s12  }
   0x5   : > { %s25_s20 = sadd.s32 1, %s576_s16  ;;  %s112_s21 = sadd.s32 1, %s568_s14 }
   0x6   : > { %p26_p0 = scmp.ge.s32.totalorder %s25_s20, 2  ;;  %p122_p1 = scmp.ne.s32.totalorder %s568_s14, %s564_s13 }
   0x7   : > { %p123_p2 = scmp.eq.s32.totalorder %s403_s18, 1  ;;  %p128_p3 = scmp.ne.s32.totalorder %s564_s13, %s560_s12 }
   0x8   : > { %s750_s20 = smov (%p26_p0, %s25_s20), 0  ;;  %p129_p5 = scmp.eq.s32.totalorder %s404_s19, 1 }
   0x9   : > { %p646_p4 = por %p123_p2, %p122_p1  ;;  %s107_s23 = ssub.s32 %s576_s16, %s750_s20 }
   0xa   : > { %p408_p6 = scmp.ge.s32.totalorder %s580_s17, 1  ;;  %p110_p7 = scmp.eq.s32.totalorder %s107_s23, 0 }
   0xb   : > { %p653_p8 = por %p129_p5, %p128_p3  ;;  %p167_p9 = scmp.lt.s32.totalorder %s580_s17, 3 }
   0xc   : > { %s659_s25 = scalar_select %p110_p7, %s568_s14, %s112_s21  }
   0xd   : > { %p168_p10 = pnand %p408_p6, %p167_p9 }
   0xe   : > { %p197_p11 = scmp.lt.s32.totalorder (!%p168_p10), %s572_s15, 1  ;;  %s414_s7 = sshll.u32 (!%p168_p10), %s572_s15, 7 }
   0xf   : > { %171 = sbr.rel (%p168_p10) target bundleno = 359 (0x167), region = 32  ;;  %s698_s18 = scalar_lea.hbm (!%p168_p10), %s741_s3, %s414_s7 }
  0x14   : > { %v224_v0 = vld [vmem:[%s739_s1 + $0x38] sm:$0xff]  ;;  %v582_v1 = vmov 0   ;;  %v583_v2 = vmov 0.0   ;;  %v223_v3 = vld [vmem:[%s739_s1 + $0x30] sm:$0xff]  ;;  %s198_s30 = scalar_select %p197_p11, %s572_s15, 1  ;;  %v222_v4 = vld [vmem:[%s739_s1 + $0x28] sm:$0xff]  ;;  %v209_v11 = vlaneseq }
  0x15   : > { %503 = vset.pattern.permute.xlu0 %v582_v1  ;;  %426 = vmatprep.subr.mxu0 %v583_v2  ;;  %vm584_vm0 = vmmov 0   ;;  %v221_v5 = vld [vmem:[%s739_s1 + $0x20] sm:$0xff]  ;;  %v220_v7 = vld [vmem:[%s739_s1 + $0x18] sm:$0xff]  ;;  %v219_v8 = vld [vmem:[%s739_s1 + $0x10] sm:$0xff]  ;;  %vm226_vm1 = vcmask 523264   ;;  %vm300_vm3 = vcmask 261120  }
  0x16   : > { %427 = vmatpush3.msra.mxu0 %v224_v0  ;;  %s410_s6 = sshll.u32 %s198_s30, 3  ;;  %442 = vmatprep.mubr.msk.f32.mxu0 %vm584_vm0, %v583_v2  ;;  %v218_v9 = vld [vmem:[%s739_s1 + $0x8] sm:$0xff]  ;;  %v217_v10 = vld [vmem:[%s739_s1] sm:$0xff]  ;;  %v210_v12 = vand.u32 127, %v209_v11  ;;  %s194_s30 = sand.u32 1, %s564_s13  }
  0x17   : > { %428 = vmatprep.subr.mxu0 %v583_v2  ;;  %s203_s9 = scalar_lea.vmem %s738_s0, %s410_s6  ;;  %s409_s4 = sshll.u32 %s194_s30, 3  ;;  %v225_v15 = vld [vmem:[%s740_s2] sm:$0xff] }
  0x18   : > { %429 = vmatpush3.msra.mxu0 %v223_v3  ;;  %v208_v6 = vld [vmem:[%s203_s9] sm:$0xff]  ;;  %s196_s8 = scalar_lea.vmem [#allocation2], %s409_s4  ;;  %s303_s19 = scalar_lea.sflag [#allocation3], %s194_s30 }
  0x19   : > { %430 = vmatprep.subr.mxu0 %v583_v2  ;;  %212 = vperm.xlu0 %503, %v208_v6   ;;  %s317_s9 = sshll.u32 %s196_s8, 4  ;;  %s585_s15 = smov [#allocation2]   ;;  %s318_s9 = int_to_ptr.vmem [resolvable:$true] %s317_s9 }
  0x1a   : > { %431 = vmatpush3.msra.mxu0 %v222_v4  ;;  %s504_s21 = scalar_lea.vmem %s318_s9, 128  ;;  %s508_s23 = sshll.u32 %s585_s15, 4  ;;  %s509_s23 = int_to_ptr.vmem [resolvable:$false] %s508_s23 }
  0x1b   : > { %432 = vmatprep.subr.mxu0 %v583_v2  ;;  %p505_p12 = scmp.ne.s32.totalorder %s318_s9, %s504_s21  ;;  %s510_s26 = scalar_lea.vmem %s509_s23, 256 }
  0x1c   : > { %433 = vmatpush3.msra.mxu0 %v221_v5  ;;  %p511_p1 = scmp.lt.s32.totalorder %s318_s9, %s509_s23  ;;  %p512_p2 = scmp.lt.s32.totalorder %s510_s26, %s504_s21 }
  0x1d   : > { %434 = vmatprep.subr.mxu0 %v583_v2  ;;  %p506_p13 = pnand %p505_p12, %p646_p4 }
  0x1e   : > { %435 = vmatpush3.msra.mxu0 %v220_v7  ;;  %p513_p3 = por %p512_p2, %p511_p1 }
  0x1f   : > { %436 = vmatprep.subr.mxu0 %v583_v2  ;;  %p507_p0 = pneg %p506_p13 }
  0x20   : > { %437 = vmatpush3.msra.mxu0 %v219_v8 }
  0x21   : > { %438 = vmatprep.subr.mxu0 %v583_v2  ;;  %p514_p5 = pnand %p513_p3, %p507_p0 }
  0x22   : > { %439 = vmatpush3.msra.mxu0 %v218_v9 }
  0x23   : > { %440 = vmatprep.subr.mxu0 %v583_v2 }
  0x24   : > { %441 = vmatpush3.msra.mxu0 %v217_v10 }
  0x94   : > { %v213_v13 = vpop.permute.xlu0 %212 }
  0x95   : > { %vm214_vm2 = vcmp.eq.s32.totalorder %v213_v13, %v210_v12 }
  0x96   : > { %v411_v14 = vsel %vm214_vm2, 1.0, %v583_v2 }
  0x97   : > { %443 = vmatmul.mubr.msk.f32.vlgmr.msra.gmra.mxu0 %vm226_vm1, %v411_v14 }
 0x157   : > { %v296_v16 = vpop.f32.mrf.mxu0 }
 0x158   : > { %v297_v17 = vadd.f32 %v296_v16, %v225_v15 }
 0x159   : > { %v444_v18 = vpop.f32.mrf.mxu0 }
 0x15a   : > { %301 = vst.msk [vmem:[%s196_s8] sm:$0xff] %vm300_vm3, %v297_v17 }
 0x15b   : > { %517 = shalt.err (!%p514_p5)
}
 0x15c   : > { %s518_s27 = scalar_lea.hbm %s698_s18, 128  ;;  %s522_s30 = scalar_lea.hbm %s741_s3, 256 }
 0x15d   : > { %p519_p6 = scmp.ne.s32.totalorder %s698_s18, %s518_s27  ;;  %p523_p10 = scmp.lt.s32.totalorder %s698_s18, %s741_s3 }
 0x15e   : > { %p524_p11 = scmp.lt.s32.totalorder %s522_s30, %s518_s27 }
 0x15f   : > { %p520_p7 = pnand %p519_p6, %p646_p4 }
 0x160   : > { %p525_p12 = por %p524_p11, %p523_p10 }
 0x161   : > { %p521_p9 = pneg %p520_p7 }
 0x163   : > { %p526_p13 = pnand %p525_p12, %p521_p9 }
 0x165   : > { %529 = shalt.err (!%p526_p13)
}
 0x166   : > { %445 = dma.vmem_to_hbm [thread:$0]  (%p646_p4), %s318_s9, 128, %s698_s18, %s303_s19  }
 0x167 PF: > { %p451_p0 = scmp.ge.s32.totalorder %s580_s17, 2  ;;  %s329_s6 = sand.u32 1, %s560_s12  }
 0x168   : > { %s330_s7 = scalar_lea.sflag [#allocation3], %s329_s6 }
 0x169   : > { %p448_p1 = pnand %p451_p0, %p653_p8 }
 0x16b   : > { %p449_p2 = pneg %p448_p1 }
 0x16d   : > { %555 = dma.done.wait (%p449_p2), %s330_s7, 128  }
 0x16e   : > { %557 = vsyncadd (%p449_p2), %s330_s7, 4294967168  ;;  %s16_s17 = sadd.s32 1, %s580_s17   ;;  %s744_s12 = smov %s564_s13 }
 0x16f   : > { %p13_p3 = scmp.ge.s32.totalorder %s16_s17, 4   ;;  %s745_s13 = smov %s568_s14 }
 0x170   : > { %s746_s14 = smov %s659_s25  ;;  %s747_s15 = smov %s576_s16 }
 0x171   : > { %s748_s16 = smov %s750_s20  ;;  %15 = sbr.rel (!%p13_p3) target bundleno = 4 (0x4), region = 70 }
 0x176   :  { %335 = vsyncpa [#allocation3], 1 }
 0x177   :  { %337 = vsyncpa [#allocation3 + $0x1], 1 }

</bundles_post_ra>
